<compile_context>
chip_gen: v5e
topology: v5e:2x2
jax: 0.10.0
libtpu: 0.0.40
codegen_flags: <defaults>
</compile_context>

<pallas_src>
import functools

import numpy as np
import jax
import jax.numpy as jnp
from jax import lax
from jax.experimental import pallas as pl
from jax.experimental.pallas import tpu as pltpu


def _round_up(x, m):
    return (x + m - 1) // m * m


# ----------------------------------------------------------------------------
# Pallas kernel: the recurrence only.  Per grid step it consumes a
# (Tc, bb, 2Hp) block of precomputed gate pre-activations, runs Tc sequential
# LiGRU updates (one fused h @ U MXU matmul + VPU gating each), and writes a
# lane-dense (Tc, bb, Hp) output block.  h is carried in VMEM scratch.
# ----------------------------------------------------------------------------
def _ligru_recurrence_kernel(w_ref, u_ref, h0_ref, out_ref, h_scratch,
                             *, approx_recip):
    tc = pl.program_id(1)                 # time-chunk index (sequential axis)

    @pl.when(tc == 0)
    def _():
        h_scratch[...] = h0_ref[...]

    u = u_ref[...]                        # (Hp, 2*Hp), resident across chunk
    hp = u_ref.shape[0]
    n_steps = w_ref.shape[0]              # Tc (static)

    def step(k, h):
        # One fused recurrent matmul, f32 accumulation on the MXU.
        gates = w_ref[k].astype(jnp.float32) + jnp.dot(
            h.astype(u.dtype), u, preferred_element_type=jnp.float32)
        at = gates[:, :hp]
        zt_pre = gates[:, hp:]
        # sigmoid; reciprocal goes to the EUP slot (approx only for bf16 path).
        zt = pl.reciprocal(1.0 + jnp.exp(-zt_pre), approx=approx_recip)
        hcand = jnp.maximum(at, 0.0)      # relu; eval-mode drop_mask == 1.0
        h_new = hcand + zt * (h - hcand)  # == zt*h + (1-zt)*hcand
        out_ref[k] = h_new.astype(out_ref.dtype)
        return h_new

    h_last = lax.fori_loop(0, n_steps, step, h_scratch[...], unroll=True)
    h_scratch[...] = h_last


# ----------------------------------------------------------------------------
# One LiGRU_Layer forward (eval mode).  Time-major in / time-major out.
# ----------------------------------------------------------------------------
def ligru_layer_forward(x_tbd, p, h0=None, compute_dtype=jnp.float32):
    """x_tbd: (T, B, D) float32  ->  (T, B, H) float32."""
    T, B, D = x_tbd.shape
    H = p["U"].shape[0]

    # ---- Hoisted input projection + BatchNorm (eval) per-channel affine:
    #      one big (T*B, D) x (D, 2H) matmul done by XLA on the MXU.
    w = jnp.einsum("tbd,dh->tbh", x_tbd.astype(jnp.float32), p["W"])
    w = w * p["bn_scale"] + p["bn_shift"]                 # (T, B, 2H)

    # ---- Tile-aligned padding (exact: padded channels/rows stay zero).
    b_mult = 16 if compute_dtype == jnp.bfloat16 else 8
    Hp = _round_up(H, 128)
    if B >= 2 * b_mult:
        bb = _round_up(-(-B // 2), b_mult)   # 2 batch blocks -> megacore/v7x
        B_pad = 2 * bb
    else:
        B_pad = _round_up(B, b_mult)
        bb = B_pad
    Tc = min(16, _round_up(T, 8))            # time-chunk size
    T_pad = _round_up(T, Tc)

    pad_tb = ((0, T_pad - T), (0, B_pad - B), (0, Hp - H))
    wa = jnp.pad(w[..., :H], pad_tb)
    wz = jnp.pad(w[..., H:], pad_tb)
    w_packed = jnp.concatenate([wa, wz], axis=-1).astype(compute_dtype)

    ua = jnp.pad(p["U"][:, :H], ((0, Hp - H), (0, Hp - H)))
    uz = jnp.pad(p["U"][:, H:], ((0, Hp - H), (0, Hp - H)))
    u_packed = jnp.concatenate([ua, uz], axis=1).astype(compute_dtype)  # (Hp,2Hp)

    if h0 is None:
        h0 = jnp.zeros((B, H), jnp.float32)
    else:
        h0 = jnp.broadcast_to(h0.astype(jnp.float32), (B, H))
    h0_pad = jnp.pad(h0, ((0, B_pad - B), (0, Hp - H)))

    # ---- Explicit VMEM budget (re-derived per tile choice; fits v7x 64 MiB).
    itemsize = np.dtype(compute_dtype).itemsize
    vmem_est = (2 * Tc * bb * 2 * Hp * itemsize     # w blocks (double-buffered)
                + 2 * Tc * bb * Hp * 4              # output blocks
                + 2 * Hp * 2 * Hp * itemsize        # fused U
                + 2 * bb * Hp * 4                   # h0 blocks
                + bb * Hp * 4)                      # h scratch
    vmem_limit = int(min(max(4 * vmem_est, 16 * 2**20), 64 * 2**20))

    kernel = functools.partial(
        _ligru_recurrence_kernel,
        approx_recip=(compute_dtype == jnp.bfloat16))

    out = pl.pallas_call(
        kernel,
        out_shape=jax.ShapeDtypeStruct((T_pad, B_pad, Hp), jnp.float32),
        grid_spec=pltpu.PrefetchScalarGridSpec(
            num_scalar_prefetch=0,
            grid=(B_pad // bb, T_pad // Tc),        # recurrence axis last
            in_specs=[
                pl.BlockSpec((Tc, bb, 2 * Hp), lambda b, t: (t, b, 0)),  # w
                pl.BlockSpec((Hp, 2 * Hp), lambda b, t: (0, 0)),         # U fused
                pl.BlockSpec((bb, Hp), lambda b, t: (b, 0)),             # h0
            ],
            out_specs=pl.BlockSpec((Tc, bb, Hp), lambda b, t: (t, b, 0)),
            scratch_shapes=[pltpu.VMEM((bb, Hp), jnp.float32)],
        ),
        compiler_params=pltpu.CompilerParams(
            dimension_semantics=("parallel", "arbitrary"),
            vmem_limit_bytes=vmem_limit),
    )(w_packed, u_packed, h0_pad)

    return out[:T, :B, :H]


# ----------------------------------------------------------------------------
# Stacked LiGRU, mirroring LiGRU.forward / _forward_ligru (eval mode).
# Activations stay time-major across layers; transpose only at entry/exit.
# ----------------------------------------------------------------------------
def ligru_forward(x, layer_params, hx=None, compute_dtype=jnp.float32):
    if x.ndim == 4:                               # (B,T,F,C) -> (B,T,F*C)
        x = x.reshape(x.shape[0], x.shape[1], -1)
    x_t = jnp.transpose(x, (1, 0, 2)).astype(jnp.float32)   # (T, B, D), once
    last = []
    for i, p in enumerate(layer_params):
        h0 = None if hx is None else hx[i]
        x_t = ligru_layer_forward(x_t, p, h0, compute_dtype)  # (T, B, H)
        last.append(x_t[-1])                                  # last timestep
    out = jnp.transpose(x_t, (1, 0, 2))            # (B, T, H), once
    h = jnp.stack(last, axis=0)                    # (L, B, H)
    return out, h


def init_ligru_params(key, input_dim, hidden, num_layers):
    """Deterministic synthetic parameters matching the module's shapes."""
    eps = 1e-5
    params = []
    d = input_dim
    for _ in range(num_layers):
        key, k1, k2 = jax.random.split(key, 3)
        # nn.Linear(d, 2H, bias=False) weight (2H, d) stored transposed.
        W = jax.random.normal(k1, (d, 2 * hidden), jnp.float32) / jnp.sqrt(d)
        U = jax.random.normal(k2, (hidden, 2 * hidden), jnp.float32) / jnp.sqrt(hidden)
        # BatchNorm1d(2H) buffers at init: mean=0, var=1, gamma=1, beta=0.
        gamma = jnp.ones((2 * hidden,), jnp.float32)
        beta = jnp.zeros((2 * hidden,), jnp.float32)
        mean = jnp.zeros((2 * hidden,), jnp.float32)
        var = jnp.ones((2 * hidden,), jnp.float32)
        scale = gamma / jnp.sqrt(var + eps)
        shift = beta - mean * scale
        params.append(dict(W=W, U=U, bn_scale=scale, bn_shift=shift))
        d = hidden
    return params


# Plain-JAX reference of the same math (correctness spot-check).
def _ligru_ref(x, layer_params):
    if x.ndim == 4:
        x = x.reshape(x.shape[0], x.shape[1], -1)
    last = []
    for p in layer_params:
        B, T, _ = x.shape
        H = p["U"].shape[0]
        w = x @ p["W"]
        w = w * p["bn_scale"] + p["bn_shift"]
        h = jnp.zeros((B, H), jnp.float32)
        outs = []
        for k in range(T):
            gates = w[:, k] + h @ p["U"]
            at, ztp = gates[:, :H], gates[:, H:]
            z = jax.nn.sigmoid(ztp)
            hcand = jnp.maximum(at, 0.0)
            h = z * h + (1.0 - z) * hcand
            outs.append(h)
        x = jnp.stack(outs, axis=1)
        last.append(x[:, -1, :])
    hh = jnp.stack(last, axis=0)
    return x, hh


if __name__ == "__main__":
    B, T, F = 2, 8, 20       # (batch, time, fea), as LiGRU expects
    HIDDEN = 32
    NUM_LAYERS = 2

    key = jax.random.PRNGKey(0)
    kx, kp = jax.random.split(key)
    x = jax.random.normal(kx, (B, T, F), jnp.float32)
    params = init_ligru_params(kp, F, HIDDEN, NUM_LAYERS)

    fwd = jax.jit(ligru_forward, static_argnames=("compute_dtype",))

    # f32 path (exact check).
    out, hh = fwd(x, params, hx=None, compute_dtype=jnp.float32)
    out = jax.block_until_ready(out)
    hh = jax.block_until_ready(hh)
    assert out.shape == (B, T, HIDDEN), out.shape
    assert hh.shape == (NUM_LAYERS, B, HIDDEN), hh.shape

    ref_out, ref_hh = _ligru_ref(x, params)
    assert jnp.allclose(out, ref_out, atol=1e-4, rtol=1e-4), \
        float(jnp.max(jnp.abs(out - ref_out)))
    assert jnp.allclose(hh, ref_hh, atol=1e-4, rtol=1e-4)

    # bf16 matmul-operand path (v5e/v6e MXU-native); recurrence stays f32.
    out_bf, hh_bf = fwd(x, params, hx=None, compute_dtype=jnp.bfloat16)
    out_bf = jax.block_until_ready(out_bf)
    assert out_bf.shape == (B, T, HIDDEN)
    assert jnp.allclose(out_bf, ref_out, atol=1.5e-1, rtol=1.5e-1)

    print("KERNEL_OK")
</pallas_src>

<mosaic_0001>
module attributes {stable_mosaic.version = 11 : i64} {
  func.func @_ligru_recurrence_kernel(%arg0: i32, %arg1: i32, %arg2: memref<8x8x256xf32, #tpu.memory_space<vmem>>, %arg3: memref<128x256xf32, #tpu.memory_space<vmem>>, %arg4: memref<8x128xf32, #tpu.memory_space<vmem>>, %arg5: memref<8x8x128xf32, #tpu.memory_space<vmem>>, %arg6: memref<8x128xf32, #tpu.memory_space<vmem>>) attributes {dimension_semantics = [#tpu.dimension_semantics<parallel>, #tpu.dimension_semantics<arbitrary>], iteration_bounds = array<i64: 1, 1>, scalar_prefetch = 0 : i64, scratch_operands = 1 : i64, tpu.core_type = #tpu.core_type<tc>, window_params = [{transform_indices = @transform_0, window_bounds = array<i64: 8, 8, 256>}, {pipeline_mode = #tpu.pipeline_mode<synchronous>, transform_indices = @transform_1, window_bounds = array<i64: 128, 256>}, {transform_indices = @transform_2, window_bounds = array<i64: 8, 128>}, {transform_indices = @transform_3, window_bounds = array<i64: 8, 8, 128>}]} {
    %c0_i32 = arith.constant 0 : i32
    %0 = arith.cmpi eq, %arg1, %c0_i32 : i32
    %1 = arith.extui %0 : i1 to i32
    %c0_i32_0 = arith.constant 0 : i32
    %2 = arith.cmpi ne, %1, %c0_i32_0 : i32
    scf.if %2 {
      %c0_70 = arith.constant 0 : index
      %c0_71 = arith.constant 0 : index
      %182 = vector.load %arg4[%c0_70, %c0_71] : memref<8x128xf32, #tpu.memory_space<vmem>>, vector<8x128xf32>
      %c0_72 = arith.constant 0 : index
      %c0_73 = arith.constant 0 : index
      %183 = vector.load %arg6[%c0_72, %c0_73] : memref<8x128xf32, #tpu.memory_space<vmem>>, vector<8x128xf32>
      tpu.vector_store %arg6[%c0_72, %c0_73], %182 {strides = array<i32>} : memref<8x128xf32, #tpu.memory_space<vmem>>, vector<8x128xf32>,
    } else {
    }
    %c0 = arith.constant 0 : index
    %c0_1 = arith.constant 0 : index
    %3 = vector.load %arg3[%c0, %c0_1] : memref<128x256xf32, #tpu.memory_space<vmem>>, vector<128x256xf32>
    %c0_2 = arith.constant 0 : index
    %c0_3 = arith.constant 0 : index
    %4 = vector.load %arg6[%c0_2, %c0_3] : memref<8x128xf32, #tpu.memory_space<vmem>>, vector<8x128xf32>
    %c0_i32_4 = arith.constant 0 : i32
    %5 = arith.index_cast %c0_i32_4 : i32 to index
    %c0_5 = arith.constant 0 : index
    %c0_6 = arith.constant 0 : index
    %6 = vector.load %arg2[%5, %c0_5, %c0_6] : memref<8x8x256xf32, #tpu.memory_space<vmem>>, vector<1x8x256xf32>
    %7 = vector.shape_cast %6 : vector<1x8x256xf32> to vector<8x256xf32>
    %cst = arith.constant dense<0.000000e+00> : vector<8x256xf32>
    %8 = tpu.matmul %4, %3, %cst {dimension_numbers = #tpu.dot_dimension_numbers<[1], [0], [0], [1], [0, 0, 1, 1], [], []>} : vector<8x128xf32>, vector<128x256xf32>, vector<8x256xf32> -> vector<8x256xf32>
    %9 = arith.addf %7, %8 : vector<8x256xf32>
    %10 = vector.extract_strided_slice %9 {offsets = [0, 0], sizes = [8, 128], strides = [1, 1]} : vector<8x256xf32> to vector<8x128xf32>
    %11 = vector.extract_strided_slice %9 {offsets = [0, 128], sizes = [8, 128], strides = [1, 1]} : vector<8x256xf32> to vector<8x128xf32>
    %cst_7 = arith.constant 0.000000e+00 : f32
    %12 = vector.broadcast %cst_7 : f32 to vector<8x128xf32>
    %13 = arith.subf %12, %11 : vector<8x128xf32>
    %14 = math.exp %13 : vector<8x128xf32>
    %cst_8 = arith.constant 1.000000e+00 : f32
    %15 = vector.broadcast %cst_8 : f32 to vector<8x128xf32>
    %16 = arith.addf %15, %14 : vector<8x128xf32>
    %17 = tpu.reciprocal %16 : vector<8x128xf32> -> vector<8x128xf32>
    %cst_9 = arith.constant 0.000000e+00 : f32
    %18 = vector.broadcast %cst_9 : f32 to vector<8x128xf32>
    %19 = arith.maximumf %10, %18 : vector<8x128xf32>
    %20 = arith.subf %4, %19 : vector<8x128xf32>
    %21 = arith.mulf %17, %20 : vector<8x128xf32>
    %22 = arith.addf %19, %21 : vector<8x128xf32>
    %23 = arith.index_cast %c0_i32_4 : i32 to index
    %c0_10 = arith.constant 0 : index
    %c0_11 = arith.constant 0 : index
    %24 = vector.load %arg5[%23, %c0_10, %c0_11] : memref<8x8x128xf32, #tpu.memory_space<vmem>>, vector<1x8x128xf32>
    %25 = vector.shape_cast %24 : vector<1x8x128xf32> to vector<8x128xf32>
    %26 = vector.shape_cast %22 : vector<8x128xf32> to vector<1x8x128xf32>
    tpu.vector_store %arg5[%23, %c0_10, %c0_11], %26 {strides = array<i32>} : memref<8x8x128xf32, #tpu.memory_space<vmem>>, vector<1x8x128xf32>,
    %c1_i32 = arith.constant 1 : i32
    %27 = arith.index_cast %c1_i32 : i32 to index
    %c0_12 = arith.constant 0 : index
    %c0_13 = arith.constant 0 : index
    %28 = vector.load %arg2[%27, %c0_12, %c0_13] : memref<8x8x256xf32, #tpu.memory_space<vmem>>, vector<1x8x256xf32>
    %29 = vector.shape_cast %28 : vector<1x8x256xf32> to vector<8x256xf32>
    %cst_14 = arith.constant dense<0.000000e+00> : vector<8x256xf32>
    %30 = tpu.matmul %22, %3, %cst_14 {dimension_numbers = #tpu.dot_dimension_numbers<[1], [0], [0], [1], [0, 0, 1, 1], [], []>} : vector<8x128xf32>, vector<128x256xf32>, vector<8x256xf32> -> vector<8x256xf32>
    %31 = arith.addf %29, %30 : vector<8x256xf32>
    %32 = vector.extract_strided_slice %31 {offsets = [0, 0], sizes = [8, 128], strides = [1, 1]} : vector<8x256xf32> to vector<8x128xf32>
    %33 = vector.extract_strided_slice %31 {offsets = [0, 128], sizes = [8, 128], strides = [1, 1]} : vector<8x256xf32> to vector<8x128xf32>
    %cst_15 = arith.constant 0.000000e+00 : f32
    %34 = vector.broadcast %cst_15 : f32 to vector<8x128xf32>
    %35 = arith.subf %34, %33 : vector<8x128xf32>
    %36 = math.exp %35 : vector<8x128xf32>
    %cst_16 = arith.constant 1.000000e+00 : f32
    %37 = vector.broadcast %cst_16 : f32 to vector<8x128xf32>
    %38 = arith.addf %37, %36 : vector<8x128xf32>
    %39 = tpu.reciprocal %38 : vector<8x128xf32> -> vector<8x128xf32>
    %cst_17 = arith.constant 0.000000e+00 : f32
    %40 = vector.broadcast %cst_17 : f32 to vector<8x128xf32>
    %41 = arith.maximumf %32, %40 : vector<8x128xf32>
    %42 = arith.subf %22, %41 : vector<8x128xf32>
    %43 = arith.mulf %39, %42 : vector<8x128xf32>
    %44 = arith.addf %41, %43 : vector<8x128xf32>
    %45 = arith.index_cast %c1_i32 : i32 to index
    %c0_18 = arith.constant 0 : index
    %c0_19 = arith.constant 0 : index
    %46 = vector.load %arg5[%45, %c0_18, %c0_19] : memref<8x8x128xf32, #tpu.memory_space<vmem>>, vector<1x8x128xf32>
    %47 = vector.shape_cast %46 : vector<1x8x128xf32> to vector<8x128xf32>
    %48 = vector.shape_cast %44 : vector<8x128xf32> to vector<1x8x128xf32>
    tpu.vector_store %arg5[%45, %c0_18, %c0_19], %48 {strides = array<i32>} : memref<8x8x128xf32, #tpu.memory_space<vmem>>, vector<1x8x128xf32>,
    %c2_i32 = arith.constant 2 : i32
    %49 = arith.index_cast %c2_i32 : i32 to index
    %c0_20 = arith.constant 0 : index
    %c0_21 = arith.constant 0 : index
    %50 = vector.load %arg2[%49, %c0_20, %c0_21] : memref<8x8x256xf32, #tpu.memory_space<vmem>>, vector<1x8x256xf32>
    %51 = vector.shape_cast %50 : vector<1x8x256xf32> to vector<8x256xf32>
    %cst_22 = arith.constant dense<0.000000e+00> : vector<8x256xf32>
    %52 = tpu.matmul %44, %3, %cst_22 {dimension_numbers = #tpu.dot_dimension_numbers<[1], [0], [0], [1], [0, 0, 1, 1], [], []>} : vector<8x128xf32>, vector<128x256xf32>, vector<8x256xf32> -> vector<8x256xf32>
    %53 = arith.addf %51, %52 : vector<8x256xf32>
    %54 = vector.extract_strided_slice %53 {offsets = [0, 0], sizes = [8, 128], strides = [1, 1]} : vector<8x256xf32> to vector<8x128xf32>
    %55 = vector.extract_strided_slice %53 {offsets = [0, 128], sizes = [8, 128], strides = [1, 1]} : vector<8x256xf32> to vector<8x128xf32>
    %cst_23 = arith.constant 0.000000e+00 : f32
    %56 = vector.broadcast %cst_23 : f32 to vector<8x128xf32>
    %57 = arith.subf %56, %55 : vector<8x128xf32>
    %58 = math.exp %57 : vector<8x128xf32>
    %cst_24 = arith.constant 1.000000e+00 : f32
    %59 = vector.broadcast %cst_24 : f32 to vector<8x128xf32>
    %60 = arith.addf %59, %58 : vector<8x128xf32>
    %61 = tpu.reciprocal %60 : vector<8x128xf32> -> vector<8x128xf32>
    %cst_25 = arith.constant 0.000000e+00 : f32
    %62 = vector.broadcast %cst_25 : f32 to vector<8x128xf32>
    %63 = arith.maximumf %54, %62 : vector<8x128xf32>
    %64 = arith.subf %44, %63 : vector<8x128xf32>
    %65 = arith.mulf %61, %64 : vector<8x128xf32>
    %66 = arith.addf %63, %65 : vector<8x128xf32>
    %67 = arith.index_cast %c2_i32 : i32 to index
    %c0_26 = arith.constant 0 : index
    %c0_27 = arith.constant 0 : index
    %68 = vector.load %arg5[%67, %c0_26, %c0_27] : memref<8x8x128xf32, #tpu.memory_space<vmem>>, vector<1x8x128xf32>
    %69 = vector.shape_cast %68 : vector<1x8x128xf32> to vector<8x128xf32>
    %70 = vector.shape_cast %66 : vector<8x128xf32> to vector<1x8x128xf32>
    tpu.vector_store %arg5[%67, %c0_26, %c0_27], %70 {strides = array<i32>} : memref<8x8x128xf32, #tpu.memory_space<vmem>>, vector<1x8x128xf32>,
    %c3_i32 = arith.constant 3 : i32
    %71 = arith.index_cast %c3_i32 : i32 to index
    %c0_28 = arith.constant 0 : index
    %c0_29 = arith.constant 0 : index
    %72 = vector.load %arg2[%71, %c0_28, %c0_29] : memref<8x8x256xf32, #tpu.memory_space<vmem>>, vector<1x8x256xf32>
    %73 = vector.shape_cast %72 : vector<1x8x256xf32> to vector<8x256xf32>
    %cst_30 = arith.constant dense<0.000000e+00> : vector<8x256xf32>
    %74 = tpu.matmul %66, %3, %cst_30 {dimension_numbers = #tpu.dot_dimension_numbers<[1], [0], [0], [1], [0, 0, 1, 1], [], []>} : vector<8x128xf32>, vector<128x256xf32>, vector<8x256xf32> -> vector<8x256xf32>
    %75 = arith.addf %73, %74 : vector<8x256xf32>
    %76 = vector.extract_strided_slice %75 {offsets = [0, 0], sizes = [8, 128], strides = [1, 1]} : vector<8x256xf32> to vector<8x128xf32>
    %77 = vector.extract_strided_slice %75 {offsets = [0, 128], sizes = [8, 128], strides = [1, 1]} : vector<8x256xf32> to vector<8x128xf32>
    %cst_31 = arith.constant 0.000000e+00 : f32
    %78 = vector.broadcast %cst_31 : f32 to vector<8x128xf32>
    %79 = arith.subf %78, %77 : vector<8x128xf32>
    %80 = math.exp %79 : vector<8x128xf32>
    %cst_32 = arith.constant 1.000000e+00 : f32
    %81 = vector.broadcast %cst_32 : f32 to vector<8x128xf32>
    %82 = arith.addf %81, %80 : vector<8x128xf32>
    %83 = tpu.reciprocal %82 : vector<8x128xf32> -> vector<8x128xf32>
    %cst_33 = arith.constant 0.000000e+00 : f32
    %84 = vector.broadcast %cst_33 : f32 to vector<8x128xf32>
    %85 = arith.maximumf %76, %84 : vector<8x128xf32>
    %86 = arith.subf %66, %85 : vector<8x128xf32>
    %87 = arith.mulf %83, %86 : vector<8x128xf32>
    %88 = arith.addf %85, %87 : vector<8x128xf32>
    %89 = arith.index_cast %c3_i32 : i32 to index
    %c0_34 = arith.constant 0 : index
    %c0_35 = arith.constant 0 : index
    %90 = vector.load %arg5[%89, %c0_34, %c0_35] : memref<8x8x128xf32, #tpu.memory_space<vmem>>, vector<1x8x128xf32>
    %91 = vector.shape_cast %90 : vector<1x8x128xf32> to vector<8x128xf32>
    %92 = vector.shape_cast %88 : vector<8x128xf32> to vector<1x8x128xf32>
    tpu.vector_store %arg5[%89, %c0_34, %c0_35], %92 {strides = array<i32>} : memref<8x8x128xf32, #tpu.memory_space<vmem>>, vector<1x8x128xf32>,
    %c4_i32 = arith.constant 4 : i32
    %93 = arith.index_cast %c4_i32 : i32 to index
    %c0_36 = arith.constant 0 : index
    %c0_37 = arith.constant 0 : index
    %94 = vector.load %arg2[%93, %c0_36, %c0_37] : memref<8x8x256xf32, #tpu.memory_space<vmem>>, vector<1x8x256xf32>
    %95 = vector.shape_cast %94 : vector<1x8x256xf32> to vector<8x256xf32>
    %cst_38 = arith.constant dense<0.000000e+00> : vector<8x256xf32>
    %96 = tpu.matmul %88, %3, %cst_38 {dimension_numbers = #tpu.dot_dimension_numbers<[1], [0], [0], [1], [0, 0, 1, 1], [], []>} : vector<8x128xf32>, vector<128x256xf32>, vector<8x256xf32> -> vector<8x256xf32>
    %97 = arith.addf %95, %96 : vector<8x256xf32>
    %98 = vector.extract_strided_slice %97 {offsets = [0, 0], sizes = [8, 128], strides = [1, 1]} : vector<8x256xf32> to vector<8x128xf32>
    %99 = vector.extract_strided_slice %97 {offsets = [0, 128], sizes = [8, 128], strides = [1, 1]} : vector<8x256xf32> to vector<8x128xf32>
    %cst_39 = arith.constant 0.000000e+00 : f32
    %100 = vector.broadcast %cst_39 : f32 to vector<8x128xf32>
    %101 = arith.subf %100, %99 : vector<8x128xf32>
    %102 = math.exp %101 : vector<8x128xf32>
    %cst_40 = arith.constant 1.000000e+00 : f32
    %103 = vector.broadcast %cst_40 : f32 to vector<8x128xf32>
    %104 = arith.addf %103, %102 : vector<8x128xf32>
    %105 = tpu.reciprocal %104 : vector<8x128xf32> -> vector<8x128xf32>
    %cst_41 = arith.constant 0.000000e+00 : f32
    %106 = vector.broadcast %cst_41 : f32 to vector<8x128xf32>
    %107 = arith.maximumf %98, %106 : vector<8x128xf32>
    %108 = arith.subf %88, %107 : vector<8x128xf32>
    %109 = arith.mulf %105, %108 : vector<8x128xf32>
    %110 = arith.addf %107, %109 : vector<8x128xf32>
    %111 = arith.index_cast %c4_i32 : i32 to index
    %c0_42 = arith.constant 0 : index
    %c0_43 = arith.constant 0 : index
    %112 = vector.load %arg5[%111, %c0_42, %c0_43] : memref<8x8x128xf32, #tpu.memory_space<vmem>>, vector<1x8x128xf32>
    %113 = vector.shape_cast %112 : vector<1x8x128xf32> to vector<8x128xf32>
    %114 = vector.shape_cast %110 : vector<8x128xf32> to vector<1x8x128xf32>
    tpu.vector_store %arg5[%111, %c0_42, %c0_43], %114 {strides = array<i32>} : memref<8x8x128xf32, #tpu.memory_space<vmem>>, vector<1x8x128xf32>,
    %c5_i32 = arith.constant 5 : i32
    %115 = arith.index_cast %c5_i32 : i32 to index
    %c0_44 = arith.constant 0 : index
    %c0_45 = arith.constant 0 : index
    %116 = vector.load %arg2[%115, %c0_44, %c0_45] : memref<8x8x256xf32, #tpu.memory_space<vmem>>, vector<1x8x256xf32>
    %117 = vector.shape_cast %116 : vector<1x8x256xf32> to vector<8x256xf32>
    %cst_46 = arith.constant dense<0.000000e+00> : vector<8x256xf32>
    %118 = tpu.matmul %110, %3, %cst_46 {dimension_numbers = #tpu.dot_dimension_numbers<[1], [0], [0], [1], [0, 0, 1, 1], [], []>} : vector<8x128xf32>, vector<128x256xf32>, vector<8x256xf32> -> vector<8x256xf32>
    %119 = arith.addf %117, %118 : vector<8x256xf32>
    %120 = vector.extract_strided_slice %119 {offsets = [0, 0], sizes = [8, 128], strides = [1, 1]} : vector<8x256xf32> to vector<8x128xf32>
    %121 = vector.extract_strided_slice %119 {offsets = [0, 128], sizes = [8, 128], strides = [1, 1]} : vector<8x256xf32> to vector<8x128xf32>
    %cst_47 = arith.constant 0.000000e+00 : f32
    %122 = vector.broadcast %cst_47 : f32 to vector<8x128xf32>
    %123 = arith.subf %122, %121 : vector<8x128xf32>
    %124 = math.exp %123 : vector<8x128xf32>
    %cst_48 = arith.constant 1.000000e+00 : f32
    %125 = vector.broadcast %cst_48 : f32 to vector<8x128xf32>
    %126 = arith.addf %125, %124 : vector<8x128xf32>
    %127 = tpu.reciprocal %126 : vector<8x128xf32> -> vector<8x128xf32>
    %cst_49 = arith.constant 0.000000e+00 : f32
    %128 = vector.broadcast %cst_49 : f32 to vector<8x128xf32>
    %129 = arith.maximumf %120, %128 : vector<8x128xf32>
    %130 = arith.subf %110, %129 : vector<8x128xf32>
    %131 = arith.mulf %127, %130 : vector<8x128xf32>
    %132 = arith.addf %129, %131 : vector<8x128xf32>
    %133 = arith.index_cast %c5_i32 : i32 to index
    %c0_50 = arith.constant 0 : index
    %c0_51 = arith.constant 0 : index
    %134 = vector.load %arg5[%133, %c0_50, %c0_51] : memref<8x8x128xf32, #tpu.memory_space<vmem>>, vector<1x8x128xf32>
    %135 = vector.shape_cast %134 : vector<1x8x128xf32> to vector<8x128xf32>
    %136 = vector.shape_cast %132 : vector<8x128xf32> to vector<1x8x128xf32>
    tpu.vector_store %arg5[%133, %c0_50, %c0_51], %136 {strides = array<i32>} : memref<8x8x128xf32, #tpu.memory_space<vmem>>, vector<1x8x128xf32>,
    %c6_i32 = arith.constant 6 : i32
    %137 = arith.index_cast %c6_i32 : i32 to index
    %c0_52 = arith.constant 0 : index
    %c0_53 = arith.constant 0 : index
    %138 = vector.load %arg2[%137, %c0_52, %c0_53] : memref<8x8x256xf32, #tpu.memory_space<vmem>>, vector<1x8x256xf32>
    %139 = vector.shape_cast %138 : vector<1x8x256xf32> to vector<8x256xf32>
    %cst_54 = arith.constant dense<0.000000e+00> : vector<8x256xf32>
    %140 = tpu.matmul %132, %3, %cst_54 {dimension_numbers = #tpu.dot_dimension_numbers<[1], [0], [0], [1], [0, 0, 1, 1], [], []>} : vector<8x128xf32>, vector<128x256xf32>, vector<8x256xf32> -> vector<8x256xf32>
    %141 = arith.addf %139, %140 : vector<8x256xf32>
    %142 = vector.extract_strided_slice %141 {offsets = [0, 0], sizes = [8, 128], strides = [1, 1]} : vector<8x256xf32> to vector<8x128xf32>
    %143 = vector.extract_strided_slice %141 {offsets = [0, 128], sizes = [8, 128], strides = [1, 1]} : vector<8x256xf32> to vector<8x128xf32>
    %cst_55 = arith.constant 0.000000e+00 : f32
    %144 = vector.broadcast %cst_55 : f32 to vector<8x128xf32>
    %145 = arith.subf %144, %143 : vector<8x128xf32>
    %146 = math.exp %145 : vector<8x128xf32>
    %cst_56 = arith.constant 1.000000e+00 : f32
    %147 = vector.broadcast %cst_56 : f32 to vector<8x128xf32>
    %148 = arith.addf %147, %146 : vector<8x128xf32>
    %149 = tpu.reciprocal %148 : vector<8x128xf32> -> vector<8x128xf32>
    %cst_57 = arith.constant 0.000000e+00 : f32
    %150 = vector.broadcast %cst_57 : f32 to vector<8x128xf32>
    %151 = arith.maximumf %142, %150 : vector<8x128xf32>
    %152 = arith.subf %132, %151 : vector<8x128xf32>
    %153 = arith.mulf %149, %152 : vector<8x128xf32>
    %154 = arith.addf %151, %153 : vector<8x128xf32>
    %155 = arith.index_cast %c6_i32 : i32 to index
    %c0_58 = arith.constant 0 : index
    %c0_59 = arith.constant 0 : index
    %156 = vector.load %arg5[%155, %c0_58, %c0_59] : memref<8x8x128xf32, #tpu.memory_space<vmem>>, vector<1x8x128xf32>
    %157 = vector.shape_cast %156 : vector<1x8x128xf32> to vector<8x128xf32>
    %158 = vector.shape_cast %154 : vector<8x128xf32> to vector<1x8x128xf32>
    tpu.vector_store %arg5[%155, %c0_58, %c0_59], %158 {strides = array<i32>} : memref<8x8x128xf32, #tpu.memory_space<vmem>>, vector<1x8x128xf32>,
    %c7_i32 = arith.constant 7 : i32
    %159 = arith.index_cast %c7_i32 : i32 to index
    %c0_60 = arith.constant 0 : index
    %c0_61 = arith.constant 0 : index
    %160 = vector.load %arg2[%159, %c0_60, %c0_61] : memref<8x8x256xf32, #tpu.memory_space<vmem>>, vector<1x8x256xf32>
    %161 = vector.shape_cast %160 : vector<1x8x256xf32> to vector<8x256xf32>
    %cst_62 = arith.constant dense<0.000000e+00> : vector<8x256xf32>
    %162 = tpu.matmul %154, %3, %cst_62 {dimension_numbers = #tpu.dot_dimension_numbers<[1], [0], [0], [1], [0, 0, 1, 1], [], []>} : vector<8x128xf32>, vector<128x256xf32>, vector<8x256xf32> -> vector<8x256xf32>
    %163 = arith.addf %161, %162 : vector<8x256xf32>
    %164 = vector.extract_strided_slice %163 {offsets = [0, 0], sizes = [8, 128], strides = [1, 1]} : vector<8x256xf32> to vector<8x128xf32>
    %165 = vector.extract_strided_slice %163 {offsets = [0, 128], sizes = [8, 128], strides = [1, 1]} : vector<8x256xf32> to vector<8x128xf32>
    %cst_63 = arith.constant 0.000000e+00 : f32
    %166 = vector.broadcast %cst_63 : f32 to vector<8x128xf32>
    %167 = arith.subf %166, %165 : vector<8x128xf32>
    %168 = math.exp %167 : vector<8x128xf32>
    %cst_64 = arith.constant 1.000000e+00 : f32
    %169 = vector.broadcast %cst_64 : f32 to vector<8x128xf32>
    %170 = arith.addf %169, %168 : vector<8x128xf32>
    %171 = tpu.reciprocal %170 : vector<8x128xf32> -> vector<8x128xf32>
    %cst_65 = arith.constant 0.000000e+00 : f32
    %172 = vector.broadcast %cst_65 : f32 to vector<8x128xf32>
    %173 = arith.maximumf %164, %172 : vector<8x128xf32>
    %174 = arith.subf %154, %173 : vector<8x128xf32>
    %175 = arith.mulf %171, %174 : vector<8x128xf32>
    %176 = arith.addf %173, %175 : vector<8x128xf32>
    %177 = arith.index_cast %c7_i32 : i32 to index
    %c0_66 = arith.constant 0 : index
    %c0_67 = arith.constant 0 : index
    %178 = vector.load %arg5[%177, %c0_66, %c0_67] : memref<8x8x128xf32, #tpu.memory_space<vmem>>, vector<1x8x128xf32>
    %179 = vector.shape_cast %178 : vector<1x8x128xf32> to vector<8x128xf32>
    %180 = vector.shape_cast %176 : vector<8x128xf32> to vector<1x8x128xf32>
    tpu.vector_store %arg5[%177, %c0_66, %c0_67], %180 {strides = array<i32>} : memref<8x8x128xf32, #tpu.memory_space<vmem>>, vector<1x8x128xf32>,
    %c8_i32 = arith.constant 8 : i32
    %c0_68 = arith.constant 0 : index
    %c0_69 = arith.constant 0 : index
    %181 = vector.load %arg6[%c0_68, %c0_69] : memref<8x128xf32, #tpu.memory_space<vmem>>, vector<8x128xf32>
    tpu.vector_store %arg6[%c0_68, %c0_69], %176 {strides = array<i32>} : memref<8x128xf32, #tpu.memory_space<vmem>>, vector<8x128xf32>,
    return
  }
  func.func @transform_0(%arg0: i32, %arg1: i32) -> (i32, i32, i32) {
    %c0_i32 = arith.constant 0 : i32
    %c0_i32_0 = arith.constant 0 : i32
    return %arg1, %arg0, %c0_i32 : i32, i32, i32
  }
  func.func @transform_1(%arg0: i32, %arg1: i32) -> (i32, i32) {
    %c0_i32 = arith.constant 0 : i32
    %c0_i32_0 = arith.constant 0 : i32
    %c0_i32_1 = arith.constant 0 : i32
    return %c0_i32, %c0_i32_0 : i32, i32
  }
  func.func @transform_2(%arg0: i32, %arg1: i32) -> (i32, i32) {
    %c0_i32 = arith.constant 0 : i32
    %c0_i32_0 = arith.constant 0 : i32
    return %arg0, %c0_i32 : i32, i32
  }
  func.func @transform_3(%arg0: i32, %arg1: i32) -> (i32, i32, i32) {
    %c0_i32 = arith.constant 0 : i32
    %c0_i32_0 = arith.constant 0 : i32
    return %arg1, %arg0, %c0_i32 : i32, i32, i32
  }
}

</mosaic_0001>

<bundles_post_ra>
// kernel: ligru_forward.2
= control target key start
LH: loop header
LB: loop body
LE: loop exit
PB: predicated region body
PF: predicated region fallthrough
CT: control target
= control target key end

     0   :  { %s1177_s1 = inlined_call_operand.vmem [shape: f32[128,256], index: 1, kind: input, shape index: {}]   ;;  %s1178_s2 = inlined_call_operand.vmem [shape: f32[8,128], index: 2, kind: input, shape index: {}]   ;;  %s1179_s0 = inlined_call_operand.vmem [shape: f32[8,8,256], index: 0, kind: input, shape index: {}]   ;;  %s1180_s3 = inlined_call_operand.vmem [shape: f32[8,8,128], index: 3, kind: output, shape index: {}]  }
   0x1   :  { %v684_v0 = vld [vmem:[%s1177_s1 + $0xf8] sm:$0xff]  ;;  %v689_v1 = vld [vmem:[%s1177_s1 + $0xe8] sm:$0xff]  ;;  %v708_v4 = vld [vmem:[%s1177_s1 + $0xf0] sm:$0xff] }
   0x2   :  { %75 = vmatpush.msra.mxu1 %v684_v0  ;;  %143 = vmatpush.msra.mxu3 %v684_v0  ;;  %v696_v2 = vld [vmem:[%s1177_s1 + $0xd8] sm:$0xff]  ;;  %v703_v3 = vld [vmem:[%s1177_s1 + $0xc8] sm:$0xff]  ;;  %v715_v5 = vld [vmem:[%s1177_s1 + $0xe0] sm:$0xff] }
   0x3   :  { %55 = vmatpush.msra.mxu0 %v708_v4  ;;  %v720_v6 = vld [vmem:[%s1177_s1 + $0xb8] sm:$0xff]  ;;  %v725_v7 = vld [vmem:[%s1177_s1 + $0xd0] sm:$0xff]  ;;  %123 = vmatpush.msra.mxu2 %v708_v4  ;;  %v734_v8 = vld [vmem:[%s1177_s1 + $0xa8] sm:$0xff] }
   0x4   :  { %76 = vmatpush.msra.mxu1 %v689_v1  ;;  %144 = vmatpush.msra.mxu3 %v689_v1  ;;  %v739_v9 = vld [vmem:[%s1177_s1 + $0xc0] sm:$0xff]  ;;  %v748_v10 = vld [vmem:[%s1177_s1 + $0x98] sm:$0xff]  ;;  %v753_v11 = vld [vmem:[%s1177_s1 + $0xb0] sm:$0xff] }
   0x5   :  { %56 = vmatpush.msra.mxu0 %v715_v5  ;;  %124 = vmatpush.msra.mxu2 %v715_v5  ;;  %v762_v12 = vld [vmem:[%s1177_s1 + $0x88] sm:$0xff]  ;;  %v767_v13 = vld [vmem:[%s1177_s1 + $0xa0] sm:$0xff]  ;;  %v776_v14 = vld [vmem:[%s1177_s1 + $0x78] sm:$0xff] }
   0x6   :  { %77 = vmatpush.msra.mxu1 %v696_v2  ;;  %145 = vmatpush.msra.mxu3 %v696_v2  ;;  %v781_v15 = vld [vmem:[%s1177_s1 + $0x90] sm:$0xff]  ;;  %v790_v16 = vld [vmem:[%s1177_s1 + $0x68] sm:$0xff]  ;;  %v795_v17 = vld [vmem:[%s1177_s1 + $0x80] sm:$0xff] }
   0x7   :  { %57 = vmatpush.msra.mxu0 %v725_v7  ;;  %125 = vmatpush.msra.mxu2 %v725_v7  ;;  %v804_v18 = vld [vmem:[%s1177_s1 + $0x58] sm:$0xff]  ;;  %v809_v19 = vld [vmem:[%s1177_s1 + $0x70] sm:$0xff]  ;;  %v818_v20 = vld [vmem:[%s1177_s1 + $0x48] sm:$0xff] }
   0x8   :  { %78 = vmatpush.msra.mxu1 %v703_v3  ;;  %146 = vmatpush.msra.mxu3 %v703_v3  ;;  %v823_v21 = vld [vmem:[%s1177_s1 + $0x60] sm:$0xff]  ;;  %v832_v22 = vld [vmem:[%s1177_s1 + $0x38] sm:$0xff]  ;;  %v837_v23 = vld [vmem:[%s1177_s1 + $0x50] sm:$0xff] }
   0x9   :  { %58 = vmatpush.msra.mxu0 %v739_v9  ;;  %126 = vmatpush.msra.mxu2 %v739_v9  ;;  %v846_v24 = vld [vmem:[%s1177_s1 + $0x28] sm:$0xff]  ;;  %v851_v25 = vld [vmem:[%s1177_s1 + $0x40] sm:$0xff]  ;;  %v860_v26 = vld [vmem:[%s1177_s1 + $0x18] sm:$0xff] }
   0xa   :  { %79 = vmatpush.msra.mxu1 %v720_v6  ;;  %147 = vmatpush.msra.mxu3 %v720_v6  ;;  %v865_v27 = vld [vmem:[%s1177_s1 + $0x30] sm:$0xff]  ;;  %v874_v28 = vld [vmem:[%s1177_s1 + $0x8] sm:$0xff]  ;;  %v879_v29 = vld [vmem:[%s1177_s1 + $0x20] sm:$0xff] }
   0xb   :  { %59 = vmatpush.msra.mxu0 %v753_v11  ;;  %127 = vmatpush.msra.mxu2 %v753_v11  ;;  %v887_v30 = vld [vmem:[%s1178_s2] sm:$0xff]  ;;  %v893_v31 = vld [vmem:[%s1177_s1 + $0x10] sm:$0xff]  ;;  %v54_v33 = vld [vmem:[%s1179_s0 + $0x8] sm:$0xff] }
   0xc   :  { %80 = vmatpush.msra.mxu1 %v734_v8  ;;  %148 = vmatpush.msra.mxu3 %v734_v8  ;;  %v903_v32 = vld [vmem:[%s1177_s1] sm:$0xff]  ;;  %v609_v57 = vld [vmem:[%s1179_s0 + $0x18] sm:$0xff] }
   0xd   :  { %60 = vmatpush.msra.mxu0 %v767_v13  ;;  %128 = vmatpush.msra.mxu2 %v767_v13  ;;  %v53_v40 = vld [vmem:[%s1179_s0] sm:$0xff] }
   0xe   :  { %81 = vmatpush.msra.mxu1 %v748_v10  ;;  %149 = vmatpush.msra.mxu3 %v748_v10 }
   0xf   :  { %61 = vmatpush.msra.mxu0 %v781_v15  ;;  %129 = vmatpush.msra.mxu2 %v781_v15 }
  0x10   :  { %82 = vmatpush.msra.mxu1 %v762_v12  ;;  %150 = vmatpush.msra.mxu3 %v762_v12 }
  0x11   :  { %62 = vmatpush.msra.mxu0 %v795_v17  ;;  %130 = vmatpush.msra.mxu2 %v795_v17 }
  0x12   :  { %83 = vmatpush.msra.mxu1 %v776_v14  ;;  %151 = vmatpush.msra.mxu3 %v776_v14 }
  0x13   :  { %63 = vmatpush.msra.mxu0 %v809_v19  ;;  %131 = vmatpush.msra.mxu2 %v809_v19 }
  0x14   :  { %84 = vmatpush.msra.mxu1 %v790_v16  ;;  %152 = vmatpush.msra.mxu3 %v790_v16 }
  0x15   :  { %64 = vmatpush.msra.mxu0 %v823_v21  ;;  %132 = vmatpush.msra.mxu2 %v823_v21 }
  0x16   :  { %85 = vmatpush.msra.mxu1 %v804_v18  ;;  %153 = vmatpush.msra.mxu3 %v804_v18 }
  0x17   :  { %65 = vmatpush.msra.mxu0 %v837_v23  ;;  %133 = vmatpush.msra.mxu2 %v837_v23 }
  0x18   :  { %86 = vmatpush.msra.mxu1 %v818_v20  ;;  %154 = vmatpush.msra.mxu3 %v818_v20 }
  0x19   :  { %66 = vmatpush.msra.mxu0 %v851_v25  ;;  %134 = vmatpush.msra.mxu2 %v851_v25 }
  0x1a   :  { %87 = vmatpush.msra.mxu1 %v832_v22  ;;  %155 = vmatpush.msra.mxu3 %v832_v22 }
  0x1b   :  { %67 = vmatpush.msra.mxu0 %v865_v27  ;;  %135 = vmatpush.msra.mxu2 %v865_v27 }
  0x1c   :  { %88 = vmatpush.msra.mxu1 %v846_v24  ;;  %156 = vmatpush.msra.mxu3 %v846_v24 }
  0x1d   :  { %68 = vmatpush.msra.mxu0 %v879_v29  ;;  %136 = vmatpush.msra.mxu2 %v879_v29 }
  0x1e   :  { %89 = vmatpush.msra.mxu1 %v860_v26  ;;  %157 = vmatpush.msra.mxu3 %v860_v26 }
  0x1f   :  { %69 = vmatpush.msra.mxu0 %v893_v31  ;;  %137 = vmatpush.msra.mxu2 %v893_v31 }
  0x20   :  { %90 = vmatpush.msra.mxu1 %v874_v28  ;;  %158 = vmatpush.msra.mxu3 %v874_v28 }
  0x21   :  { %91 = vmatmul.f32.vlgmr.msra.gmra.mxu1 %v887_v30  ;;  %70 = vmatpush.msra.mxu0 %v903_v32 }
  0x22   :  { %212 = vmatpush.msrb.mxu1 %v684_v0  ;;  %281 = vmatpush.msrb.mxu3 %v684_v0 }
  0x23   :  { %71 = vmatmul.f32.vlgmr.msra.gmra.mxu0 %v887_v30  ;;  %138 = vmatpush.msra.mxu2 %v903_v32 }
  0x24   :  { %192 = vmatpush.msrb.mxu0 %v708_v4  ;;  %213 = vmatpush.msrb.mxu1 %v689_v1 }
  0x25   :  { %261 = vmatpush.msrb.mxu2 %v708_v4  ;;  %282 = vmatpush.msrb.mxu3 %v689_v1 }
  0x26   :  { %193 = vmatpush.msrb.mxu0 %v715_v5  ;;  %214 = vmatpush.msrb.mxu1 %v696_v2 }
  0x27   :  { %262 = vmatpush.msrb.mxu2 %v715_v5  ;;  %283 = vmatpush.msrb.mxu3 %v696_v2 }
  0x28   :  { %194 = vmatpush.msrb.mxu0 %v725_v7  ;;  %215 = vmatpush.msrb.mxu1 %v703_v3 }
  0x29   :  { %263 = vmatpush.msrb.mxu2 %v725_v7  ;;  %284 = vmatpush.msrb.mxu3 %v703_v3 }
  0x2a   :  { %195 = vmatpush.msrb.mxu0 %v739_v9  ;;  %216 = vmatpush.msrb.mxu1 %v720_v6 }
  0x2b   :  { %264 = vmatpush.msrb.mxu2 %v739_v9  ;;  %285 = vmatpush.msrb.mxu3 %v720_v6 }
  0x2c   :  { %196 = vmatpush.msrb.mxu0 %v753_v11  ;;  %217 = vmatpush.msrb.mxu1 %v734_v8 }
  0x2d   :  { %265 = vmatpush.msrb.mxu2 %v753_v11  ;;  %286 = vmatpush.msrb.mxu3 %v734_v8 }
  0x2e   :  { %197 = vmatpush.msrb.mxu0 %v767_v13  ;;  %218 = vmatpush.msrb.mxu1 %v748_v10 }
  0x2f   :  { %266 = vmatpush.msrb.mxu2 %v767_v13  ;;  %287 = vmatpush.msrb.mxu3 %v748_v10 }
  0x30   :  { %198 = vmatpush.msrb.mxu0 %v781_v15  ;;  %219 = vmatpush.msrb.mxu1 %v762_v12 }
  0x31   :  { %267 = vmatpush.msrb.mxu2 %v781_v15  ;;  %288 = vmatpush.msrb.mxu3 %v762_v12 }
  0x32   :  { %199 = vmatpush.msrb.mxu0 %v795_v17  ;;  %220 = vmatpush.msrb.mxu1 %v776_v14 }
  0x33   :  { %268 = vmatpush.msrb.mxu2 %v795_v17  ;;  %289 = vmatpush.msrb.mxu3 %v776_v14 }
  0x34   :  { %200 = vmatpush.msrb.mxu0 %v809_v19  ;;  %221 = vmatpush.msrb.mxu1 %v790_v16 }
  0x35   :  { %269 = vmatpush.msrb.mxu2 %v809_v19  ;;  %290 = vmatpush.msrb.mxu3 %v790_v16 }
  0x36   :  { %201 = vmatpush.msrb.mxu0 %v823_v21  ;;  %222 = vmatpush.msrb.mxu1 %v804_v18 }
  0x37   :  { %270 = vmatpush.msrb.mxu2 %v823_v21  ;;  %291 = vmatpush.msrb.mxu3 %v804_v18 }
  0x38   :  { %202 = vmatpush.msrb.mxu0 %v837_v23  ;;  %223 = vmatpush.msrb.mxu1 %v818_v20 }
  0x39   :  { %271 = vmatpush.msrb.mxu2 %v837_v23  ;;  %292 = vmatpush.msrb.mxu3 %v818_v20 }
  0x3a   :  { %203 = vmatpush.msrb.mxu0 %v851_v25  ;;  %224 = vmatpush.msrb.mxu1 %v832_v22 }
  0x3b   :  { %272 = vmatpush.msrb.mxu2 %v851_v25  ;;  %293 = vmatpush.msrb.mxu3 %v832_v22 }
  0x3c   :  { %204 = vmatpush.msrb.mxu0 %v865_v27  ;;  %225 = vmatpush.msrb.mxu1 %v846_v24 }
  0x3d   :  { %273 = vmatpush.msrb.mxu2 %v865_v27  ;;  %294 = vmatpush.msrb.mxu3 %v846_v24 }
  0x3e   :  { %205 = vmatpush.msrb.mxu0 %v879_v29  ;;  %226 = vmatpush.msrb.mxu1 %v860_v26 }
  0x3f   :  { %274 = vmatpush.msrb.mxu2 %v879_v29  ;;  %295 = vmatpush.msrb.mxu3 %v860_v26 }
  0x40   :  { %206 = vmatpush.msrb.mxu0 %v893_v31  ;;  %227 = vmatpush.msrb.mxu1 %v874_v28 }
  0x41   :  { %275 = vmatpush.msrb.mxu2 %v893_v31  ;;  %296 = vmatpush.msrb.mxu3 %v874_v28 }
  0x42   :  { %207 = vmatpush.msrb.mxu0 %v903_v32  ;;  %350 = vmatpush.msra.mxu1 %v684_v0 }
  0x43   :  { %276 = vmatpush.msrb.mxu2 %v903_v32 }
  0x44   :  { %330 = vmatpush.msra.mxu0 %v708_v4  ;;  %351 = vmatpush.msra.mxu1 %v689_v1 }
  0x46   :  { %331 = vmatpush.msra.mxu0 %v715_v5  ;;  %352 = vmatpush.msra.mxu1 %v696_v2 }
  0x48   :  { %332 = vmatpush.msra.mxu0 %v725_v7  ;;  %353 = vmatpush.msra.mxu1 %v703_v3 }
  0x4a   :  { %333 = vmatpush.msra.mxu0 %v739_v9  ;;  %354 = vmatpush.msra.mxu1 %v720_v6 }
  0x4c   :  { %334 = vmatpush.msra.mxu0 %v753_v11  ;;  %355 = vmatpush.msra.mxu1 %v734_v8 }
  0x4e   :  { %335 = vmatpush.msra.mxu0 %v767_v13  ;;  %356 = vmatpush.msra.mxu1 %v748_v10 }
  0x50   :  { %336 = vmatpush.msra.mxu0 %v781_v15  ;;  %357 = vmatpush.msra.mxu1 %v762_v12 }
  0x52   :  { %337 = vmatpush.msra.mxu0 %v795_v17  ;;  %358 = vmatpush.msra.mxu1 %v776_v14 }
  0x54   :  { %338 = vmatpush.msra.mxu0 %v809_v19  ;;  %359 = vmatpush.msra.mxu1 %v790_v16 }
  0x56   :  { %339 = vmatpush.msra.mxu0 %v823_v21  ;;  %360 = vmatpush.msra.mxu1 %v804_v18 }
  0x58   :  { %340 = vmatpush.msra.mxu0 %v837_v23  ;;  %361 = vmatpush.msra.mxu1 %v818_v20 }
  0x5a   :  { %341 = vmatpush.msra.mxu0 %v851_v25  ;;  %362 = vmatpush.msra.mxu1 %v832_v22 }
  0x5c   :  { %342 = vmatpush.msra.mxu0 %v865_v27  ;;  %363 = vmatpush.msra.mxu1 %v846_v24 }
  0x5e   :  { %343 = vmatpush.msra.mxu0 %v879_v29  ;;  %364 = vmatpush.msra.mxu1 %v860_v26 }
  0x60   :  { %344 = vmatpush.msra.mxu0 %v893_v31  ;;  %365 = vmatpush.msra.mxu1 %v874_v28 }
  0x62   :  { %345 = vmatpush.msra.mxu0 %v903_v32 }
  0x9e   :  { %v92_v34 = vpop.f32.mrf.mxu1 }
  0x9f   :  { %v96_v35 = vadd.f32 %v92_v34, %v54_v33 }
  0xa0   :  { %v72_v41 = vpop.f32.mrf.mxu0 }
  0xa1   :  { %v97_v36 = vsub.f32 0.0, %v96_v35  ;;  %v95_v42 = vadd.f32 %v72_v41, %v53_v40 }
  0xa3   :  { %v98_v37 = vmul.f32 1.442695, %v97_v36  ;;  %v115_v46 = vmax.f32 %v95_v42, 0.0 }
  0xa5   :  { %629 = vpow2.f32 %v98_v37  ;;  %v116_v51 = vsub.f32 %v887_v30, %v115_v46  ;;  %v608_v30 = vld [vmem:[%s1179_s0 + $0x10] sm:$0xff] }
  0xab   :  { %v630_v38 = vpop.eup %629 }
  0xac   :  { %v100_v39 = vadd.f32 1.0, %v630_v38 }
  0xae   :  { %631 = vrcp.f32 %v100_v39  ;;  %v112_v47 = vand.u32 2147483648, %v100_v39  ;;  %v110_v49 = vand.u32 2147483647, %v100_v39  ;;  %vm106_vm1 = vweird.f32 %v100_v39 }
  0xb0   :  { %v113_v52 = vor.u32 1.1754944e-38, %v112_v47  ;;  %vm111_vm3 = vcmp.eq.f32.partialorder %v110_v49, 8.507059e+37  ;;  %v612_v49 = vld [vmem:[%s1179_s0 + $0x28] sm:$0xff] }
  0xb4   :  { %v632_v43 = vpop.eup %631 }
  0xb5   :  { %v102_v44 = vmul.f32 %v632_v43, %v100_v39  ;;  %vm107_vm0 = vweird.f32 %v632_v43 }
  0xb6   :  { %vm108_vm2 = vmor %vm106_vm1, %vm107_vm0 }
  0xb7   :  { %v103_v45 = vsub.f32 1.0, %v102_v44 }
  0xb9   :  { %v104_v48 = vmul.f32 %v632_v43, %v103_v45 }
  0xbb   :  { %v105_v50 = vadd.f32 %v632_v43, %v104_v48 }
  0xbd   :  { %v109_v53 = vsel %vm108_vm2, %v632_v43, %v105_v50 }
  0xbe   :  { %v114_v54 = vsel %vm111_vm3, %v113_v52, %v109_v53 }
  0xbf   :  { %v117_v55 = vmul.f32 %v116_v51, %v114_v54 }
  0xc1   :  { %v118_v56 = vadd.f32 %v117_v55, %v115_v46 }
  0xc3   :  { %119 = vst [vmem:[%s1180_s3] sm:$0xff] %v118_v56  ;;  %139 = vmatmul.f32.vlgmr.msra.gmra.mxu2 %v118_v56  ;;  %159 = vmatmul.f32.vlgmr.msra.gmra.mxu3 %v118_v56 }
  0xc4   :  { %399 = vmatpush.msra.mxu2 %v708_v4  ;;  %419 = vmatpush.msra.mxu3 %v684_v0 }
  0xc6   :  { %400 = vmatpush.msra.mxu2 %v715_v5  ;;  %420 = vmatpush.msra.mxu3 %v689_v1 }
  0xc8   :  { %401 = vmatpush.msra.mxu2 %v725_v7  ;;  %421 = vmatpush.msra.mxu3 %v696_v2 }
  0xca   :  { %402 = vmatpush.msra.mxu2 %v739_v9  ;;  %422 = vmatpush.msra.mxu3 %v703_v3 }
  0xcc   :  { %403 = vmatpush.msra.mxu2 %v753_v11  ;;  %423 = vmatpush.msra.mxu3 %v720_v6 }
  0xce   :  { %404 = vmatpush.msra.mxu2 %v767_v13  ;;  %424 = vmatpush.msra.mxu3 %v734_v8 }
  0xd0   :  { %405 = vmatpush.msra.mxu2 %v781_v15  ;;  %425 = vmatpush.msra.mxu3 %v748_v10 }
  0xd2   :  { %406 = vmatpush.msra.mxu2 %v795_v17  ;;  %426 = vmatpush.msra.mxu3 %v762_v12 }
  0xd4   :  { %407 = vmatpush.msra.mxu2 %v809_v19  ;;  %427 = vmatpush.msra.mxu3 %v776_v14 }
  0xd6   :  { %408 = vmatpush.msra.mxu2 %v823_v21  ;;  %428 = vmatpush.msra.mxu3 %v790_v16 }
  0xd8   :  { %409 = vmatpush.msra.mxu2 %v837_v23  ;;  %429 = vmatpush.msra.mxu3 %v804_v18 }
  0xda   :  { %410 = vmatpush.msra.mxu2 %v851_v25  ;;  %430 = vmatpush.msra.mxu3 %v818_v20 }
  0xdc   :  { %411 = vmatpush.msra.mxu2 %v865_v27  ;;  %431 = vmatpush.msra.mxu3 %v832_v22 }
  0xde   :  { %412 = vmatpush.msra.mxu2 %v879_v29  ;;  %432 = vmatpush.msra.mxu3 %v846_v24 }
  0xe0   :  { %413 = vmatpush.msra.mxu2 %v893_v31  ;;  %433 = vmatpush.msra.mxu3 %v860_v26 }
  0xe2   :  { %414 = vmatpush.msra.mxu2 %v903_v32  ;;  %434 = vmatpush.msra.mxu3 %v874_v28 }
 0x146   :  { %v160_v58 = vpop.f32.mrf.mxu3  ;;  %v140_v33 = vpop.f32.mrf.mxu2 }
 0x147   :  { %v164_v59 = vadd.f32 %v609_v57, %v160_v58  ;;  %v163_v35 = vadd.f32 %v608_v30, %v140_v33 }
 0x149   :  { %v165_v60 = vsub.f32 0.0, %v164_v59  ;;  %v183_v39 = vmax.f32 %v163_v35, 0.0 }
 0x14b   :  { %v166_v61 = vmul.f32 1.442695, %v165_v60  ;;  %v184_v44 = vsub.f32 %v118_v56, %v183_v39  ;;  %v611_v56 = vld [vmem:[%s1179_s0 + $0x20] sm:$0xff] }
 0x14d   :  { %633 = vpow2.f32 %v166_v61 }
 0x153   :  { %v634_v62 = vpop.eup %633 }
 0x154   :  { %v168_v63 = vadd.f32 1.0, %v634_v62 }
 0x156   :  { %635 = vrcp.f32 %v168_v63  ;;  %v180_v38 = vand.u32 2147483648, %v168_v63  ;;  %v178_v41 = vand.u32 2147483647, %v168_v63  ;;  %vm174_vm5 = vweird.f32 %v168_v63 }
 0x158   :  { %v181_v43 = vor.u32 1.1754944e-38, %v180_v38  ;;  %vm179_vm7 = vcmp.eq.f32.partialorder %v178_v41, 8.507059e+37 }
 0x15c   :  { %v636_v34 = vpop.eup %635 }
 0x15d   :  { %v170_v36 = vmul.f32 %v636_v34, %v168_v63  ;;  %vm175_vm4 = vweird.f32 %v636_v34 }
 0x15e   :  { %vm176_vm6 = vmor %vm174_vm5, %vm175_vm4 }
 0x15f   :  { %v171_v37 = vsub.f32 1.0, %v170_v36 }
 0x161   :  { %v172_v40 = vmul.f32 %v636_v34, %v171_v37 }
 0x163   :  { %v173_v42 = vadd.f32 %v636_v34, %v172_v40 }
 0x165   :  { %v177_v45 = vsel %vm176_vm6, %v636_v34, %v173_v42 }
 0x166   :  { %v182_v46 = vsel %vm179_vm7, %v181_v43, %v177_v45 }
 0x167   :  { %v185_v47 = vmul.f32 %v184_v44, %v182_v46 }
 0x169   :  { %v186_v48 = vadd.f32 %v185_v47, %v183_v39 }
 0x16b   :  { %610 = vst [vmem:[%s1180_s3 + $0x8] sm:$0xff] %v186_v48  ;;  %208 = vmatmul.f32.vlgmr.msrb.gmra.mxu0 %v186_v48  ;;  %228 = vmatmul.f32.vlgmr.msrb.gmra.mxu1 %v186_v48 }
 0x16c   :  { %468 = vmatpush.msrb.mxu0 %v708_v4  ;;  %488 = vmatpush.msrb.mxu1 %v684_v0 }
 0x16e   :  { %469 = vmatpush.msrb.mxu0 %v715_v5  ;;  %489 = vmatpush.msrb.mxu1 %v689_v1 }
 0x170   :  { %470 = vmatpush.msrb.mxu0 %v725_v7  ;;  %490 = vmatpush.msrb.mxu1 %v696_v2 }
 0x172   :  { %471 = vmatpush.msrb.mxu0 %v739_v9  ;;  %491 = vmatpush.msrb.mxu1 %v703_v3 }
 0x174   :  { %472 = vmatpush.msrb.mxu0 %v753_v11  ;;  %492 = vmatpush.msrb.mxu1 %v720_v6 }
 0x176   :  { %473 = vmatpush.msrb.mxu0 %v767_v13  ;;  %493 = vmatpush.msrb.mxu1 %v734_v8 }
 0x178   :  { %474 = vmatpush.msrb.mxu0 %v781_v15  ;;  %494 = vmatpush.msrb.mxu1 %v748_v10 }
 0x17a   :  { %475 = vmatpush.msrb.mxu0 %v795_v17  ;;  %495 = vmatpush.msrb.mxu1 %v762_v12 }
 0x17c   :  { %476 = vmatpush.msrb.mxu0 %v809_v19  ;;  %496 = vmatpush.msrb.mxu1 %v776_v14 }
 0x17e   :  { %477 = vmatpush.msrb.mxu0 %v823_v21  ;;  %497 = vmatpush.msrb.mxu1 %v790_v16 }
 0x180   :  { %478 = vmatpush.msrb.mxu0 %v837_v23  ;;  %498 = vmatpush.msrb.mxu1 %v804_v18 }
 0x182   :  { %479 = vmatpush.msrb.mxu0 %v851_v25  ;;  %499 = vmatpush.msrb.mxu1 %v818_v20 }
 0x184   :  { %480 = vmatpush.msrb.mxu0 %v865_v27  ;;  %500 = vmatpush.msrb.mxu1 %v832_v22 }
 0x186   :  { %481 = vmatpush.msrb.mxu0 %v879_v29  ;;  %501 = vmatpush.msrb.mxu1 %v846_v24 }
 0x188   :  { %482 = vmatpush.msrb.mxu0 %v893_v31  ;;  %502 = vmatpush.msrb.mxu1 %v860_v26 }
 0x18a   :  { %483 = vmatpush.msrb.mxu0 %v903_v32  ;;  %503 = vmatpush.msrb.mxu1 %v874_v28 }
 0x1e8   :  { %v229_v50 = vpop.f32.mrf.mxu1  ;;  %v209_v57 = vpop.f32.mrf.mxu0 }
 0x1e9   :  { %v233_v51 = vadd.f32 %v612_v49, %v229_v50  ;;  %v232_v59 = vadd.f32 %v611_v56, %v209_v57  ;;  %v621_v57 = vld [vmem:[%s1179_s0 + $0x58] sm:$0xff] }
 0x1eb   :  { %v234_v52 = vsub.f32 0.0, %v233_v51  ;;  %v252_v63 = vmax.f32 %v232_v59, 0.0 }
 0x1ed   :  { %v235_v53 = vmul.f32 1.442695, %v234_v52  ;;  %v253_v36 = vsub.f32 %v186_v48, %v252_v63 }
 0x1ef   :  { %637 = vpow2.f32 %v235_v53 }
 0x1f5   :  { %v638_v54 = vpop.eup %637 }
 0x1f6   :  { %v237_v55 = vadd.f32 1.0, %v638_v54 }
 0x1f8   :  { %639 = vrcp.f32 %v237_v55  ;;  %v249_v62 = vand.u32 2147483648, %v237_v55  ;;  %v247_v33 = vand.u32 2147483647, %v237_v55  ;;  %vm243_vm9 = vweird.f32 %v237_v55 }
 0x1fa   :  { %v250_v35 = vor.u32 1.1754944e-38, %v249_v62  ;;  %vm248_vm11 = vcmp.eq.f32.partialorder %v247_v33, 8.507059e+37 }
 0x1fe   :  { %v640_v58 = vpop.eup %639 }
 0x1ff   :  { %v239_v60 = vmul.f32 %v640_v58, %v237_v55  ;;  %vm244_vm8 = vweird.f32 %v640_v58 }
 0x200   :  { %vm245_vm10 = vmor %vm243_vm9, %vm244_vm8 }
 0x201   :  { %v240_v61 = vsub.f32 1.0, %v239_v60 }
 0x203   :  { %v241_v30 = vmul.f32 %v640_v58, %v240_v61 }
 0x205   :  { %v242_v34 = vadd.f32 %v640_v58, %v241_v30  ;;  %v620_v30 = vld [vmem:[%s1179_s0 + $0x50] sm:$0xff] }
 0x207   :  { %v246_v37 = vsel %vm245_vm10, %v640_v58, %v242_v34 }
 0x208   :  { %v251_v38 = vsel %vm248_vm11, %v250_v35, %v246_v37 }
 0x209   :  { %v254_v39 = vmul.f32 %v253_v36, %v251_v38 }
 0x20b   :  { %v255_v40 = vadd.f32 %v254_v39, %v252_v63 }
 0x20d   :  { %613 = vst [vmem:[%s1180_s3 + $0x10] sm:$0xff] %v255_v40  ;;  %277 = vmatmul.f32.vlgmr.msrb.gmra.mxu2 %v255_v40  ;;  %297 = vmatmul.f32.vlgmr.msrb.gmra.mxu3 %v255_v40 }
 0x20e   :  { %537 = vmatpush.msrb.mxu2 %v708_v4  ;;  %557 = vmatpush.msrb.mxu3 %v684_v0  ;;  %v615_v0 = vld [vmem:[%s1179_s0 + $0x38] sm:$0xff] }
 0x210   :  { %538 = vmatpush.msrb.mxu2 %v715_v5  ;;  %558 = vmatpush.msrb.mxu3 %v689_v1 }
 0x212   :  { %539 = vmatpush.msrb.mxu2 %v725_v7  ;;  %559 = vmatpush.msrb.mxu3 %v696_v2  ;;  %v614_v7 = vld [vmem:[%s1179_s0 + $0x30] sm:$0xff] }
 0x214   :  { %540 = vmatpush.msrb.mxu2 %v739_v9  ;;  %560 = vmatpush.msrb.mxu3 %v703_v3 }
 0x216   :  { %541 = vmatpush.msrb.mxu2 %v753_v11  ;;  %561 = vmatpush.msrb.mxu3 %v720_v6 }
 0x218   :  { %542 = vmatpush.msrb.mxu2 %v767_v13  ;;  %562 = vmatpush.msrb.mxu3 %v734_v8 }
 0x21a   :  { %543 = vmatpush.msrb.mxu2 %v781_v15  ;;  %563 = vmatpush.msrb.mxu3 %v748_v10 }
 0x21c   :  { %544 = vmatpush.msrb.mxu2 %v795_v17  ;;  %564 = vmatpush.msrb.mxu3 %v762_v12 }
 0x21e   :  { %545 = vmatpush.msrb.mxu2 %v809_v19  ;;  %565 = vmatpush.msrb.mxu3 %v776_v14 }
 0x220   :  { %546 = vmatpush.msrb.mxu2 %v823_v21  ;;  %566 = vmatpush.msrb.mxu3 %v790_v16 }
 0x222   :  { %547 = vmatpush.msrb.mxu2 %v837_v23  ;;  %567 = vmatpush.msrb.mxu3 %v804_v18 }
 0x224   :  { %548 = vmatpush.msrb.mxu2 %v851_v25  ;;  %568 = vmatpush.msrb.mxu3 %v818_v20 }
 0x226   :  { %549 = vmatpush.msrb.mxu2 %v865_v27  ;;  %569 = vmatpush.msrb.mxu3 %v832_v22 }
 0x228   :  { %550 = vmatpush.msrb.mxu2 %v879_v29  ;;  %570 = vmatpush.msrb.mxu3 %v846_v24  ;;  %v618_v24 = vld [vmem:[%s1179_s0 + $0x48] sm:$0xff] }
 0x22a   :  { %551 = vmatpush.msrb.mxu2 %v893_v31  ;;  %571 = vmatpush.msrb.mxu3 %v860_v26 }
 0x22c   :  { %552 = vmatpush.msrb.mxu2 %v903_v32  ;;  %572 = vmatpush.msrb.mxu3 %v874_v28  ;;  %v617_v32 = vld [vmem:[%s1179_s0 + $0x40] sm:$0xff] }
 0x290   :  { %v298_v1 = vpop.f32.mrf.mxu3  ;;  %v278_v8 = vpop.f32.mrf.mxu2 }
 0x291   :  { %v302_v2 = vadd.f32 %v615_v0, %v298_v1  ;;  %v301_v10 = vadd.f32 %v614_v7, %v278_v8  ;;  %v624_v8 = vld [vmem:[%s1179_s0 + $0x68] sm:$0xff] }
 0x293   :  { %v303_v3 = vsub.f32 0.0, %v302_v2  ;;  %v321_v14 = vmax.f32 %v301_v10, 0.0 }
 0x295   :  { %v304_v4 = vmul.f32 1.442695, %v303_v3  ;;  %v322_v19 = vsub.f32 %v255_v40, %v321_v14 }
 0x297   :  { %641 = vpow2.f32 %v304_v4 }
 0x29d   :  { %v642_v5 = vpop.eup %641 }
 0x29e   :  { %v306_v6 = vadd.f32 1.0, %v642_v5 }
 0x2a0   :  { %643 = vrcp.f32 %v306_v6  ;;  %v318_v13 = vand.u32 2147483648, %v306_v6  ;;  %v316_v16 = vand.u32 2147483647, %v306_v6  ;;  %vm312_vm13 = vweird.f32 %v306_v6 }
 0x2a2   :  { %v319_v18 = vor.u32 1.1754944e-38, %v318_v13  ;;  %vm317_vm15 = vcmp.eq.f32.partialorder %v316_v16, 8.507059e+37 }
 0x2a6   :  { %v644_v9 = vpop.eup %643 }
 0x2a7   :  { %v308_v11 = vmul.f32 %v644_v9, %v306_v6  ;;  %vm313_vm12 = vweird.f32 %v644_v9 }
 0x2a8   :  { %vm314_vm14 = vmor %vm312_vm13, %vm313_vm12 }
 0x2a9   :  { %v309_v12 = vsub.f32 1.0, %v308_v11 }
 0x2ab   :  { %v310_v15 = vmul.f32 %v644_v9, %v309_v12 }
 0x2ad   :  { %v311_v17 = vadd.f32 %v644_v9, %v310_v15  ;;  %v623_v15 = vld [vmem:[%s1179_s0 + $0x60] sm:$0xff] }
 0x2af   :  { %v315_v20 = vsel %vm314_vm14, %v644_v9, %v311_v17 }
 0x2b0   :  { %v320_v21 = vsel %vm317_vm15, %v319_v18, %v315_v20 }
 0x2b1   :  { %v323_v22 = vmul.f32 %v322_v19, %v320_v21 }
 0x2b3   :  { %v324_v23 = vadd.f32 %v323_v22, %v321_v14 }
 0x2b5   :  { %616 = vst [vmem:[%s1180_s3 + $0x18] sm:$0xff] %v324_v23  ;;  %346 = vmatmul.f32.vlgmr.msra.gmra.mxu0 %v324_v23  ;;  %366 = vmatmul.f32.vlgmr.msra.gmra.mxu1 %v324_v23 }
 0x332   :  { %v367_v25 = vpop.f32.mrf.mxu1  ;;  %v347_v41 = vpop.f32.mrf.mxu0 }
 0x333   :  { %v371_v26 = vadd.f32 %v618_v24, %v367_v25  ;;  %v370_v43 = vadd.f32 %v617_v32, %v347_v41  ;;  %v627_v41 = vld [vmem:[%s1179_s0 + $0x78] sm:$0xff] }
 0x335   :  { %v372_v27 = vsub.f32 0.0, %v371_v26  ;;  %v390_v47 = vmax.f32 %v370_v43, 0.0 }
 0x337   :  { %v373_v28 = vmul.f32 1.442695, %v372_v27  ;;  %v391_v52 = vsub.f32 %v324_v23, %v390_v47 }
 0x339   :  { %645 = vpow2.f32 %v373_v28 }
 0x33f   :  { %v646_v29 = vpop.eup %645 }
 0x340   :  { %v375_v31 = vadd.f32 1.0, %v646_v29 }
 0x342   :  { %647 = vrcp.f32 %v375_v31  ;;  %v387_v46 = vand.u32 2147483648, %v375_v31  ;;  %v385_v49 = vand.u32 2147483647, %v375_v31  ;;  %vm381_vm1 = vweird.f32 %v375_v31 }
 0x344   :  { %v388_v51 = vor.u32 1.1754944e-38, %v387_v46  ;;  %vm386_vm3 = vcmp.eq.f32.partialorder %v385_v49, 8.507059e+37 }
 0x348   :  { %v648_v42 = vpop.eup %647 }
 0x349   :  { %v377_v44 = vmul.f32 %v648_v42, %v375_v31  ;;  %vm382_vm0 = vweird.f32 %v648_v42 }
 0x34a   :  { %vm383_vm2 = vmor %vm381_vm1, %vm382_vm0 }
 0x34b   :  { %v378_v45 = vsub.f32 1.0, %v377_v44 }
 0x34d   :  { %v379_v48 = vmul.f32 %v648_v42, %v378_v45 }
 0x34f   :  { %v380_v50 = vadd.f32 %v648_v42, %v379_v48  ;;  %v626_v48 = vld [vmem:[%s1179_s0 + $0x70] sm:$0xff] }
 0x351   :  { %v384_v53 = vsel %vm383_vm2, %v648_v42, %v380_v50 }
 0x352   :  { %v389_v54 = vsel %vm386_vm3, %v388_v51, %v384_v53 }
 0x353   :  { %v392_v55 = vmul.f32 %v391_v52, %v389_v54 }
 0x355   :  { %v393_v56 = vadd.f32 %v392_v55, %v390_v47 }
 0x357   :  { %619 = vst [vmem:[%s1180_s3 + $0x20] sm:$0xff] %v393_v56  ;;  %415 = vmatmul.f32.vlgmr.msra.gmra.mxu2 %v393_v56  ;;  %435 = vmatmul.f32.vlgmr.msra.gmra.mxu3 %v393_v56 }
 0x3da   :  { %v436_v58 = vpop.f32.mrf.mxu3  ;;  %v416_v33 = vpop.f32.mrf.mxu2 }
 0x3db   :  { %v440_v59 = vadd.f32 %v621_v57, %v436_v58  ;;  %v439_v35 = vadd.f32 %v620_v30, %v416_v33 }
 0x3dd   :  { %v441_v60 = vsub.f32 0.0, %v440_v59  ;;  %v459_v39 = vmax.f32 %v439_v35, 0.0 }
 0x3df   :  { %v442_v61 = vmul.f32 1.442695, %v441_v60  ;;  %v460_v3 = vsub.f32 %v393_v56, %v459_v39 }
 0x3e1   :  { %649 = vpow2.f32 %v442_v61 }
 0x3e7   :  { %v650_v62 = vpop.eup %649 }
 0x3e8   :  { %v444_v63 = vadd.f32 1.0, %v650_v62 }
 0x3ea   :  { %651 = vrcp.f32 %v444_v63  ;;  %v456_v38 = vand.u32 2147483648, %v444_v63  ;;  %v454_v0 = vand.u32 2147483647, %v444_v63  ;;  %vm450_vm5 = vweird.f32 %v444_v63 }
 0x3ec   :  { %v457_v2 = vor.u32 1.1754944e-38, %v456_v38  ;;  %vm455_vm7 = vcmp.eq.f32.partialorder %v454_v0, 8.507059e+37 }
 0x3f0   :  { %v652_v34 = vpop.eup %651 }
 0x3f1   :  { %v446_v36 = vmul.f32 %v652_v34, %v444_v63  ;;  %vm451_vm4 = vweird.f32 %v652_v34 }
 0x3f2   :  { %vm452_vm6 = vmor %vm450_vm5, %vm451_vm4 }
 0x3f3   :  { %v447_v37 = vsub.f32 1.0, %v446_v36 }
 0x3f5   :  { %v448_v40 = vmul.f32 %v652_v34, %v447_v37 }
 0x3f7   :  { %v449_v1 = vadd.f32 %v652_v34, %v448_v40 }
 0x3f9   :  { %v453_v4 = vsel %vm452_vm6, %v652_v34, %v449_v1 }
 0x3fa   :  { %v458_v5 = vsel %vm455_vm7, %v457_v2, %v453_v4 }
 0x3fb   :  { %v461_v6 = vmul.f32 %v460_v3, %v458_v5 }
 0x3fd   :  { %v462_v7 = vadd.f32 %v461_v6, %v459_v39 }
 0x3ff   :  { %622 = vst [vmem:[%s1180_s3 + $0x28] sm:$0xff] %v462_v7  ;;  %484 = vmatmul.f32.vlgmr.msrb.gmra.mxu0 %v462_v7  ;;  %504 = vmatmul.f32.vlgmr.msrb.gmra.mxu1 %v462_v7 }
 0x47c   :  { %v505_v9 = vpop.f32.mrf.mxu1  ;;  %v485_v16 = vpop.f32.mrf.mxu0 }
 0x47d   :  { %v509_v10 = vadd.f32 %v624_v8, %v505_v9  ;;  %v508_v18 = vadd.f32 %v623_v15, %v485_v16 }
 0x47f   :  { %v510_v11 = vsub.f32 0.0, %v509_v10  ;;  %v528_v22 = vmax.f32 %v508_v18, 0.0 }
 0x481   :  { %v511_v12 = vmul.f32 1.442695, %v510_v11  ;;  %v529_v27 = vsub.f32 %v462_v7, %v528_v22 }
 0x483   :  { %653 = vpow2.f32 %v511_v12 }
 0x489   :  { %v654_v13 = vpop.eup %653 }
 0x48a   :  { %v513_v14 = vadd.f32 1.0, %v654_v13 }
 0x48c   :  { %655 = vrcp.f32 %v513_v14  ;;  %v525_v21 = vand.u32 2147483648, %v513_v14  ;;  %v523_v24 = vand.u32 2147483647, %v513_v14  ;;  %vm519_vm9 = vweird.f32 %v513_v14 }
 0x48e   :  { %v526_v26 = vor.u32 1.1754944e-38, %v525_v21  ;;  %vm524_vm11 = vcmp.eq.f32.partialorder %v523_v24, 8.507059e+37 }
 0x492   :  { %v656_v17 = vpop.eup %655 }
 0x493   :  { %v515_v19 = vmul.f32 %v656_v17, %v513_v14  ;;  %vm520_vm8 = vweird.f32 %v656_v17 }
 0x494   :  { %vm521_vm10 = vmor %vm519_vm9, %vm520_vm8 }
 0x495   :  { %v516_v20 = vsub.f32 1.0, %v515_v19 }
 0x497   :  { %v517_v23 = vmul.f32 %v656_v17, %v516_v20 }
 0x499   :  { %v518_v25 = vadd.f32 %v656_v17, %v517_v23 }
 0x49b   :  { %v522_v28 = vsel %vm521_vm10, %v656_v17, %v518_v25 }
 0x49c   :  { %v527_v29 = vsel %vm524_vm11, %v526_v26, %v522_v28 }
 0x49d   :  { %v530_v31 = vmul.f32 %v529_v27, %v527_v29 }
 0x49f   :  { %v531_v32 = vadd.f32 %v530_v31, %v528_v22 }
 0x4a1   :  { %625 = vst [vmem:[%s1180_s3 + $0x30] sm:$0xff] %v531_v32  ;;  %553 = vmatmul.f32.vlgmr.msrb.gmra.mxu2 %v531_v32  ;;  %573 = vmatmul.f32.vlgmr.msrb.gmra.mxu3 %v531_v32 }
 0x524   :  { %v574_v42 = vpop.f32.mrf.mxu3  ;;  %v554_v49 = vpop.f32.mrf.mxu2 }
 0x525   :  { %v578_v43 = vadd.f32 %v627_v41, %v574_v42  ;;  %v577_v51 = vadd.f32 %v626_v48, %v554_v49 }
 0x527   :  { %v579_v44 = vsub.f32 0.0, %v578_v43  ;;  %v597_v55 = vmax.f32 %v577_v51, 0.0 }
 0x529   :  { %v580_v45 = vmul.f32 1.442695, %v579_v44  ;;  %v598_v60 = vsub.f32 %v531_v32, %v597_v55 }
 0x52b   :  { %657 = vpow2.f32 %v580_v45 }
 0x531   :  { %v658_v46 = vpop.eup %657 }
 0x532   :  { %v582_v47 = vadd.f32 1.0, %v658_v46 }
 0x534   :  { %659 = vrcp.f32 %v582_v47  ;;  %v594_v54 = vand.u32 2147483648, %v582_v47  ;;  %v592_v57 = vand.u32 2147483647, %v582_v47  ;;  %vm588_vm13 = vweird.f32 %v582_v47 }
 0x536   :  { %v595_v59 = vor.u32 1.1754944e-38, %v594_v54  ;;  %vm593_vm15 = vcmp.eq.f32.partialorder %v592_v57, 8.507059e+37 }
 0x53a   :  { %v660_v50 = vpop.eup %659 }
 0x53b   :  { %v584_v52 = vmul.f32 %v660_v50, %v582_v47  ;;  %vm589_vm12 = vweird.f32 %v660_v50 }
 0x53c   :  { %vm590_vm14 = vmor %vm588_vm13, %vm589_vm12 }
 0x53d   :  { %v585_v53 = vsub.f32 1.0, %v584_v52 }
 0x53f   :  { %v586_v56 = vmul.f32 %v660_v50, %v585_v53 }
 0x541   :  { %v587_v58 = vadd.f32 %v660_v50, %v586_v56 }
 0x543   :  { %v591_v61 = vsel %vm590_vm14, %v660_v50, %v587_v58 }
 0x544   :  { %v596_v62 = vsel %vm593_vm15, %v595_v59, %v591_v61 }
 0x545   :  { %v599_v63 = vmul.f32 %v598_v60, %v596_v62 }
 0x547   :  { %v600_v30 = vadd.f32 %v599_v63, %v597_v55 }
 0x549   :  { %628 = vst [vmem:[%s1180_s3 + $0x38] sm:$0xff] %v600_v30 }

</bundles_post_ra>
